<compile_context>
chip_gen: v5e
topology: v5e:2x2
jax: 0.10.0
libtpu: 0.0.40
codegen_flags: <defaults>
</compile_context>

<pallas_src>
import math

import jax
import jax.numpy as jnp
from jax import lax
from jax.experimental import pallas as pl
from jax.experimental.pallas import tpu as pltpu


def _make_kernel(Bt, S, D, H, d_k, flatten_out):
    scale = 1.0 / math.sqrt(d_k)

    def kernel(q_ref, k_ref, mask_ref, wq_ref, bq_ref, wk_ref, bk_ref, out_ref):
        # blocks: q/k (Bt,S,D); mask (Bt,1,S); wq/wk (H,D,d_k); bq/bk (H,1,d_k)
        wq = wq_ref[...]
        wk = wk_ref[...]
        bq = bq_ref[...]
        bk = bk_ref[...]

        dn_proj = (((2,), (1,)), ((0,), (0,)))   # (H,S,D) x (H,D,d_k) -> (H,S,d_k)
        dn_qk = (((2,), (2,)), ((0,), (0,)))     # (H,S,d_k) x (H,S,d_k) -> (H,S,S)

        for bi in range(Bt):                     # static unroll, Bt is small
            q = q_ref[bi]                        # (S, D)
            k = k_ref[bi]                        # (S, D)
            qb = jnp.broadcast_to(q[None], (H, S, D))
            kb = jnp.broadcast_to(k[None], (H, S, D))

            # Per-head linear projections, all heads batched on the MXU.
            qh = lax.dot_general(qb, wq, dn_proj,
                                 preferred_element_type=jnp.float32) + bq
            kh = lax.dot_general(kb, wk, dn_proj,
                                 preferred_element_type=jnp.float32) + bk

            # QK^T for all heads at once; contraction on the last dim of both
            # operands (no transpose of kh, no XLU vxpose).
            scores = lax.dot_general(qh, kh, dn_qk,
                                     preferred_element_type=jnp.float32) * scale

            # Mask compare once per batch element, broadcast over heads / rows.
            keep = mask_ref[bi]                  # (1, S)
            scores = jnp.where((keep == 0.0)[None], jnp.float32(-1e9), scores)

            # Softmax over keys.
            m = jnp.max(scores, axis=-1, keepdims=True)
            e = jnp.exp(scores - m)
            l = jnp.sum(e, axis=-1, keepdims=True)
            p = e * pl.reciprocal(l, approx=False)

            # TODO(synk): nn.Dropout(p=0.1) on p_attn omitted (eval-mode / identity).
            if flatten_out:
                out_ref[bi] = p.reshape(H * S * S).astype(out_ref.dtype)
            else:
                out_ref[bi] = p.astype(out_ref.dtype)

    return kernel


def _pick_batch_block(B):
    # Pack several batch elements per grid step to amortise per-step overhead,
    # but keep >= 2 grid steps so the "parallel" axis can span both v7x cores.
    for bt in (8, 4, 2):
        if B % bt == 0 and B // bt >= 2:
            return bt
    return 1


def _build_call(B, S, D, H, Bt, flatten_out):
    d_k = D // H
    kernel = _make_kernel(Bt, S, D, H, d_k, flatten_out)

    if flatten_out:
        out_shape = jax.ShapeDtypeStruct((B, H * S * S), jnp.float32)
        out_specs = pl.BlockSpec((Bt, H * S * S), lambda b: (b, 0))
    else:
        out_shape = jax.ShapeDtypeStruct((B, H, S, S), jnp.float32)
        out_specs = pl.BlockSpec((Bt, H, S, S), lambda b: (b, 0, 0, 0))

    # Rough VMEM budget (double-buffered blocks + temporaries), clamped so it
    # is safe on every generation (v5e default scoped limit is 16 MiB, v7x has
    # only 64 MiB physical per TensorCore).
    block_bytes = 4 * (2 * Bt * S * D + Bt * S + 2 * H * D * d_k + 2 * H * d_k
                       + Bt * H * S * S)
    vmem_limit = int(min(64 * 1024 * 1024, max(16 * 1024 * 1024, 8 * block_bytes)))

    return pl.pallas_call(
        kernel,
        out_shape=out_shape,
        grid_spec=pltpu.PrefetchScalarGridSpec(
            num_scalar_prefetch=0,
            grid=(B // Bt,),
            in_specs=[
                pl.BlockSpec((Bt, S, D), lambda b: (b, 0, 0)),    # query
                pl.BlockSpec((Bt, S, D), lambda b: (b, 0, 0)),    # key
                pl.BlockSpec((Bt, 1, S), lambda b: (b, 0, 0)),    # mask (per batch)
                pl.BlockSpec((H, D, d_k), lambda b: (0, 0, 0)),   # Wq, split per head
                pl.BlockSpec((H, 1, d_k), lambda b: (0, 0, 0)),   # bq
                pl.BlockSpec((H, D, d_k), lambda b: (0, 0, 0)),   # Wk, split per head
                pl.BlockSpec((H, 1, d_k), lambda b: (0, 0, 0)),   # bk
            ],
            out_specs=out_specs,
        ),
        compiler_params=pltpu.CompilerParams(
            dimension_semantics=("parallel",),
            vmem_limit_bytes=vmem_limit,
        ),
    )


def multi_head_attention(query, key, mask, wq_t, bq, wk_t, bk, h):
    """query/key: (B,S,D); mask: (B,1,S_total); wq_t/wk_t: (D,D) already W^T;
    bq/bk: (1,D). Returns attention probabilities (B, h, S, S)."""
    B, S, D = query.shape
    d_k = D // h
    mask = mask[:, :, :S]            # mirrors: mask = mask[:, :, :query.size(1)]

    # Pre-split the projection weights/biases per head in plain XLA (outside
    # the kernel) so the kernel can run one head-batched dot_general and never
    # needs a lane-splitting reshape of the projected activations.
    wq_heads = wq_t.reshape(D, h, d_k).transpose(1, 0, 2)   # (h, D, d_k)
    wk_heads = wk_t.reshape(D, h, d_k).transpose(1, 0, 2)
    bq_heads = bq.reshape(h, 1, d_k)
    bk_heads = bk.reshape(h, 1, d_k)

    args = (query, key, mask, wq_heads, bq_heads, wk_heads, bk_heads)
    Bt = _pick_batch_block(B)

    # TODO(synk): for large S, tile queries/keys flash-style (online softmax)
    # instead of holding the full (H,S,S) scores block (v7x has 64 MiB VMEM).
    if S < 128:
        # Lane-dense flat output: avoids sub-128-lane masked stores when S < 128.
        try:
            out = jax.block_until_ready(_build_call(B, S, D, h, Bt, True)(*args))
            return out.reshape(B, h, S, S)
        except Exception:
            pass  # fall back to the plain 4-D output layout below
    return _build_call(B, S, D, h, Bt, False)(*args)


def reference_mha(query, key, mask, wq_t, bq, wk_t, bk, h):
    """Pure-JAX reference mirroring the PyTorch forward."""
    B, S, D = query.shape
    d_k = D // h
    m = mask[:, :, :S][:, None, :, :]                       # (B, 1, 1, S)
    qp = (query @ wq_t + bq).reshape(B, S, h, d_k).transpose(0, 2, 1, 3)
    kp = (key @ wk_t + bk).reshape(B, S, h, d_k).transpose(0, 2, 1, 3)
    scores = jnp.einsum("bhqd,bhkd->bhqk", qp, kp) / math.sqrt(d_k)
    scores = jnp.where(m == 0.0, -1e9, scores)
    return jax.nn.softmax(scores, axis=-1)


if __name__ == "__main__":
    B, S, D, H = 2, 8, 32, 4
    S_total = 12  # mask comes in longer and gets sliced to S, as in the module

    key0 = jax.random.PRNGKey(0)
    k1, k2, k3, k4, k5, k6, k7 = jax.random.split(key0, 7)

    query = jax.random.normal(k1, (B, S, D), dtype=jnp.float32)
    key_in = jax.random.normal(k2, (B, S, D), dtype=jnp.float32)
    mask = (jax.random.uniform(k3, (B, 1, S_total)) > 0.25).astype(jnp.float32)

    # nn.Linear(d_model, d_model) params, init uniform(-1/sqrt(D), 1/sqrt(D)).
    bound = 1.0 / math.sqrt(D)
    wq_pt = jax.random.uniform(k4, (D, D), minval=-bound, maxval=bound, dtype=jnp.float32)
    bq_pt = jax.random.uniform(k5, (D,), minval=-bound, maxval=bound, dtype=jnp.float32)
    wk_pt = jax.random.uniform(k6, (D, D), minval=-bound, maxval=bound, dtype=jnp.float32)
    bk_pt = jax.random.uniform(k7, (D,), minval=-bound, maxval=bound, dtype=jnp.float32)

    # Pre-transpose torch-style (out,in) weights so the kernel does x @ W.
    wq_t = wq_pt.T
    wk_t = wk_pt.T
    bq = bq_pt.reshape(1, D)
    bk = bk_pt.reshape(1, D)

    out = multi_head_attention(query, key_in, mask, wq_t, bq, wk_t, bk, H)
    out = jax.block_until_ready(out)

    ref = reference_mha(query, key_in, mask, wq_t, bq, wk_t, bk, H)
    assert out.shape == (B, H, S, S)
    assert jnp.allclose(out, ref, atol=1e-5, rtol=1e-5), "mismatch vs reference"

    print("KERNEL_OK")
</pallas_src>

<mosaic_0001>
module attributes {stable_mosaic.version = 11 : i64} {
  func.func @kernel(%arg0: i32, %arg1: memref<1x8x32xf32, #tpu.memory_space<vmem>>, %arg2: memref<1x8x32xf32, #tpu.memory_space<vmem>>, %arg3: memref<1x1x8xf32, #tpu.memory_space<vmem>>, %arg4: memref<4x32x8xf32, #tpu.memory_space<vmem>>, %arg5: memref<4x1x8xf32, #tpu.memory_space<vmem>>, %arg6: memref<4x32x8xf32, #tpu.memory_space<vmem>>, %arg7: memref<4x1x8xf32, #tpu.memory_space<vmem>>, %arg8: memref<1x4x8x8xf32, #tpu.memory_space<vmem>>) attributes {dimension_semantics = [#tpu.dimension_semantics<parallel>], iteration_bounds = array<i64: 2>, scalar_prefetch = 0 : i64, scratch_operands = 0 : i64, tpu.core_type = #tpu.core_type<tc>, window_params = [{transform_indices = @transform_0, window_bounds = array<i64: 1, 8, 32>}, {transform_indices = @transform_1, window_bounds = array<i64: 1, 8, 32>}, {transform_indices = @transform_2, window_bounds = array<i64: 1, 1, 8>}, {pipeline_mode = #tpu.pipeline_mode<synchronous>, transform_indices = @transform_3, window_bounds = array<i64: 4, 32, 8>}, {pipeline_mode = #tpu.pipeline_mode<synchronous>, transform_indices = @transform_4, window_bounds = array<i64: 4, 1, 8>}, {pipeline_mode = #tpu.pipeline_mode<synchronous>, transform_indices = @transform_5, window_bounds = array<i64: 4, 32, 8>}, {pipeline_mode = #tpu.pipeline_mode<synchronous>, transform_indices = @transform_6, window_bounds = array<i64: 4, 1, 8>}, {transform_indices = @transform_7, window_bounds = array<i64: 1, 4, 8, 8>}]} {
    %c0 = arith.constant 0 : index
    %c0_0 = arith.constant 0 : index
    %c0_1 = arith.constant 0 : index
    %0 = vector.load %arg4[%c0, %c0_0, %c0_1] : memref<4x32x8xf32, #tpu.memory_space<vmem>>, vector<4x32x8xf32>
    %c0_2 = arith.constant 0 : index
    %c0_3 = arith.constant 0 : index
    %c0_4 = arith.constant 0 : index
    %1 = vector.load %arg6[%c0_2, %c0_3, %c0_4] : memref<4x32x8xf32, #tpu.memory_space<vmem>>, vector<4x32x8xf32>
    %c0_5 = arith.constant 0 : index
    %c0_6 = arith.constant 0 : index
    %c0_7 = arith.constant 0 : index
    %2 = vector.load %arg5[%c0_5, %c0_6, %c0_7] : memref<4x1x8xf32, #tpu.memory_space<vmem>>, vector<4x1x8xf32>
    %c0_8 = arith.constant 0 : index
    %c0_9 = arith.constant 0 : index
    %c0_10 = arith.constant 0 : index
    %3 = vector.load %arg7[%c0_8, %c0_9, %c0_10] : memref<4x1x8xf32, #tpu.memory_space<vmem>>, vector<4x1x8xf32>
    %c0_11 = arith.constant 0 : index
    %c0_12 = arith.constant 0 : index
    %c0_13 = arith.constant 0 : index
    %4 = vector.load %arg1[%c0_11, %c0_12, %c0_13] : memref<1x8x32xf32, #tpu.memory_space<vmem>>, vector<1x8x32xf32>
    %5 = vector.shape_cast %4 : vector<1x8x32xf32> to vector<8x32xf32>
    %c0_14 = arith.constant 0 : index
    %c0_15 = arith.constant 0 : index
    %c0_16 = arith.constant 0 : index
    %6 = vector.load %arg2[%c0_14, %c0_15, %c0_16] : memref<1x8x32xf32, #tpu.memory_space<vmem>>, vector<1x8x32xf32>
    %7 = vector.shape_cast %6 : vector<1x8x32xf32> to vector<8x32xf32>
    %8 = vector.shape_cast %5 : vector<8x32xf32> to vector<1x8x32xf32>
    %9 = vector.shape_cast %8 : vector<1x8x32xf32> to vector<1x8x32xf32>
    %10 = vector.broadcast %9 : vector<1x8x32xf32> to vector<4x8x32xf32>
    %11 = vector.shape_cast %7 : vector<8x32xf32> to vector<1x8x32xf32>
    %12 = vector.shape_cast %11 : vector<1x8x32xf32> to vector<1x8x32xf32>
    %13 = vector.broadcast %12 : vector<1x8x32xf32> to vector<4x8x32xf32>
    %cst = arith.constant dense<0.000000e+00> : vector<4x8x8xf32>
    %14 = tpu.matmul %10, %0, %cst {dimension_numbers = #tpu.dot_dimension_numbers<[2], [1], [1], [2], [0, 0, 0, 1, 1, 2], [0], [0]>} : vector<4x8x32xf32>, vector<4x32x8xf32>, vector<4x8x8xf32> -> vector<4x8x8xf32>
    %15 = vector.broadcast %2 : vector<4x1x8xf32> to vector<4x8x8xf32>
    %16 = arith.addf %14, %15 : vector<4x8x8xf32>
    %cst_17 = arith.constant dense<0.000000e+00> : vector<4x8x8xf32>
    %17 = tpu.matmul %13, %1, %cst_17 {dimension_numbers = #tpu.dot_dimension_numbers<[2], [1], [1], [2], [0, 0, 0, 1, 1, 2], [0], [0]>} : vector<4x8x32xf32>, vector<4x32x8xf32>, vector<4x8x8xf32> -> vector<4x8x8xf32>
    %18 = vector.broadcast %3 : vector<4x1x8xf32> to vector<4x8x8xf32>
    %19 = arith.addf %17, %18 : vector<4x8x8xf32>
    %cst_18 = arith.constant dense<0.000000e+00> : vector<4x8x8xf32>
    %20 = tpu.matmul %16, %19, %cst_18 {dimension_numbers = #tpu.dot_dimension_numbers<[2], [2], [1], [1], [0, 0, 0, 1, 1, 1], [0], [0]>} : vector<4x8x8xf32>, vector<4x8x8xf32>, vector<4x8x8xf32> -> vector<4x8x8xf32>
    %cst_19 = arith.constant 0.353553385 : f32
    %21 = vector.broadcast %cst_19 : f32 to vector<4x8x8xf32>
    %22 = arith.mulf %20, %21 : vector<4x8x8xf32>
    %c0_20 = arith.constant 0 : index
    %c0_21 = arith.constant 0 : index
    %c0_22 = arith.constant 0 : index
    %23 = vector.load %arg3[%c0_20, %c0_21, %c0_22] : memref<1x1x8xf32, #tpu.memory_space<vmem>>, vector<1x1x8xf32>
    %24 = vector.shape_cast %23 : vector<1x1x8xf32> to vector<1x8xf32>
    %cst_23 = arith.constant 0.000000e+00 : f32
    %25 = vector.broadcast %cst_23 : f32 to vector<1x8xf32>
    %26 = arith.cmpf oeq, %24, %25 : vector<1x8xf32>
    %27 = vector.shape_cast %26 : vector<1x8xi1> to vector<1x1x8xi1>
    %cst_24 = arith.constant -1.000000e+09 : f32
    %28 = vector.shape_cast %27 : vector<1x1x8xi1> to vector<1x1x8xi1>
    %29 = vector.broadcast %28 : vector<1x1x8xi1> to vector<4x8x8xi1>
    %30 = vector.broadcast %cst_24 : f32 to vector<4x8x8xf32>
    %31 = arith.select %29, %30, %22 : vector<4x8x8xi1>, vector<4x8x8xf32>
    %cst_25 = arith.constant dense<0xFF800000> : vector<4x8xf32>
    %32 = vector.multi_reduction <maximumf>, %31, %cst_25 [2] : vector<4x8x8xf32> to vector<4x8xf32>
    %33 = vector.shape_cast %32 : vector<4x8xf32> to vector<4x8x1xf32>
    %34 = vector.broadcast %33 : vector<4x8x1xf32> to vector<4x8x8xf32>
    %35 = arith.subf %31, %34 : vector<4x8x8xf32>
    %36 = math.exp %35 : vector<4x8x8xf32>
    %cst_26 = arith.constant dense<0.000000e+00> : vector<4x8xf32>
    %37 = vector.multi_reduction <add>, %36, %cst_26 [2] : vector<4x8x8xf32> to vector<4x8xf32>
    %38 = vector.shape_cast %37 : vector<4x8xf32> to vector<4x8x1xf32>
    %39 = tpu.reciprocal %38 : vector<4x8x1xf32> -> vector<4x8x1xf32>
    %40 = vector.broadcast %39 : vector<4x8x1xf32> to vector<4x8x8xf32>
    %41 = arith.mulf %36, %40 : vector<4x8x8xf32>
    %c0_27 = arith.constant 0 : index
    %c0_28 = arith.constant 0 : index
    %c0_29 = arith.constant 0 : index
    %c0_30 = arith.constant 0 : index
    %42 = vector.load %arg8[%c0_27, %c0_28, %c0_29, %c0_30] : memref<1x4x8x8xf32, #tpu.memory_space<vmem>>, vector<1x4x8x8xf32>
    %43 = vector.shape_cast %42 : vector<1x4x8x8xf32> to vector<4x8x8xf32>
    %44 = vector.shape_cast %41 : vector<4x8x8xf32> to vector<1x4x8x8xf32>
    tpu.vector_store %arg8[%c0_27, %c0_28, %c0_29, %c0_30], %44 {strides = array<i32>} : memref<1x4x8x8xf32, #tpu.memory_space<vmem>>, vector<1x4x8x8xf32>,
    return
  }
  func.func @transform_0(%arg0: i32) -> (i32, i32, i32) {
    %c0_i32 = arith.constant 0 : i32
    %c0_i32_0 = arith.constant 0 : i32
    %c0_i32_1 = arith.constant 0 : i32
    return %arg0, %c0_i32, %c0_i32_0 : i32, i32, i32
  }
  func.func @transform_1(%arg0: i32) -> (i32, i32, i32) {
    %c0_i32 = arith.constant 0 : i32
    %c0_i32_0 = arith.constant 0 : i32
    %c0_i32_1 = arith.constant 0 : i32
    return %arg0, %c0_i32, %c0_i32_0 : i32, i32, i32
  }
  func.func @transform_2(%arg0: i32) -> (i32, i32, i32) {
    %c0_i32 = arith.constant 0 : i32
    %c0_i32_0 = arith.constant 0 : i32
    %c0_i32_1 = arith.constant 0 : i32
    return %arg0, %c0_i32, %c0_i32_0 : i32, i32, i32
  }
  func.func @transform_3(%arg0: i32) -> (i32, i32, i32) {
    %c0_i32 = arith.constant 0 : i32
    %c0_i32_0 = arith.constant 0 : i32
    %c0_i32_1 = arith.constant 0 : i32
    %c0_i32_2 = arith.constant 0 : i32
    return %c0_i32, %c0_i32_0, %c0_i32_1 : i32, i32, i32
  }
  func.func @transform_4(%arg0: i32) -> (i32, i32, i32) {
    %c0_i32 = arith.constant 0 : i32
    %c0_i32_0 = arith.constant 0 : i32
    %c0_i32_1 = arith.constant 0 : i32
    %c0_i32_2 = arith.constant 0 : i32
    return %c0_i32, %c0_i32_0, %c0_i32_1 : i32, i32, i32
  }
  func.func @transform_5(%arg0: i32) -> (i32, i32, i32) {
    %c0_i32 = arith.constant 0 : i32
    %c0_i32_0 = arith.constant 0 : i32
    %c0_i32_1 = arith.constant 0 : i32
    %c0_i32_2 = arith.constant 0 : i32
    return %c0_i32, %c0_i32_0, %c0_i32_1 : i32, i32, i32
  }
  func.func @transform_6(%arg0: i32) -> (i32, i32, i32) {
    %c0_i32 = arith.constant 0 : i32
    %c0_i32_0 = arith.constant 0 : i32
    %c0_i32_1 = arith.constant 0 : i32
    %c0_i32_2 = arith.constant 0 : i32
    return %c0_i32, %c0_i32_0, %c0_i32_1 : i32, i32, i32
  }
  func.func @transform_7(%arg0: i32) -> (i32, i32, i32, i32) {
    %c0_i32 = arith.constant 0 : i32
    %c0_i32_0 = arith.constant 0 : i32
    %c0_i32_1 = arith.constant 0 : i32
    %c0_i32_2 = arith.constant 0 : i32
    return %arg0, %c0_i32, %c0_i32_0, %c0_i32_1 : i32, i32, i32, i32
  }
}

</mosaic_0001>

<bundles_post_ra>
// kernel: tpu_custom_call.1
= control target key start
LH: loop header
LB: loop body
LE: loop exit
PB: predicated region body
PF: predicated region fallthrough
CT: control target
= control target key end

     0   :  { %12 = vsyncpa [#allocation3], 0  ;;  %s1335_s0 = inlined_call_operand.vmem [shape: f32[2,8,32], index: 0, kind: input, shape index: {}]   ;;  %s1336_s1 = inlined_call_operand.vmem [shape: f32[2,8,32], index: 1, kind: input, shape index: {}]   ;;  %s1337_s2 = inlined_call_operand.vmem [shape: f32[2,1,8], index: 2, kind: input, shape index: {}]   ;;  %s1338_s3 = inlined_call_operand.vmem [shape: f32[4,32,8], index: 3, kind: input, shape index: {}]   ;;  %s1339_s4 = inlined_call_operand.vmem [shape: f32[4,1,8], index: 4, kind: input, shape index: {}]   ;;  %s1340_s5 = inlined_call_operand.vmem [shape: f32[4,32,8], index: 5, kind: input, shape index: {}]   ;;  %s1341_s6 = inlined_call_operand.vmem [shape: f32[4,1,8], index: 6, kind: input, shape index: {}]   ;;  %s1342_s7 = inlined_call_operand.hbm [shape: f32[2,4,8,8], index: 7, kind: output, shape index: {}]  }
   0x1   :  { %14 = vsyncpa [#allocation3 + $0x1], 0  ;;  %s1057_s24 = smov 0   ;;  %s1059_s25 = smov 0  }
   0x2   :  { %s1061_s26 = smov 0   ;;  %s1063_s27 = smov 0  }
   0x3 LB: > { %s1078_s28 = sadd.s32 4294967295, %s1012_s27   ;;  %s855_s29 = sadd.s32 4294967294, %s1012_s27   ;;  %s1012_s27 = sphi %s1063_s27, %s1350_s27   ;;  %s1008_s26 = sphi %s1061_s26, %s1349_s26   ;;  %s1004_s25 = sphi %s1059_s25, %s1348_s25   ;;  %s1000_s24 = sphi %s1057_s24, %s1347_s24  }
   0x4   : > { %s1082_s30 = sadd.s32 1, %s1012_s27   ;;  %s189_s8 = sadd.s32 1, %s1008_s26 }
   0x5   : > { %s186_s9 = ssub.s32 %s1012_s27, %s1082_s30  ;;  %p199_p0 = scmp.ne.s32.totalorder %s1008_s26, %s1004_s25 }
   0x6   : > { %p187_p1 = scmp.eq.s32.totalorder %s186_s9, 0  ;;  %p200_p2 = scmp.eq.s32.totalorder %s1078_s28, 1 }
   0x7   : > { %p205_p3 = scmp.ne.s32.totalorder %s1004_s25, %s1000_s24  ;;  %p206_p4 = scmp.eq.s32.totalorder %s855_s29, 1 }
   0x8   : > { %s1093_s10 = scalar_select %p187_p1, %s1008_s26, %s189_s8  }
   0x9   : > { %p1095_p5 = por %p200_p2, %p199_p0  ;;  %p1099_p6 = por %p206_p4, %p205_p3 }
   0xa   : > { %p858_p7 = scmp.ge.s32.totalorder %s1012_s27, 1  ;;  %p256_p8 = scmp.lt.s32.totalorder %s1012_s27, 3 }
   0xc   : > { %p257_p9 = pnand %p858_p7, %p256_p8 }
   0xd   : > { %p294_p10 = scmp.lt.s32.totalorder (!%p257_p9), %s1078_s28, 1 }
   0xe   : > { %260 = sbr.rel (%p257_p9) target bundleno = 585 (0x249), region = 48 }
  0x13   : > { %v308_v0 = vld [vmem:[%s1338_s3 + $0x18] sm:$0xff]  ;;  %v307_v3 = vld [vmem:[%s1338_s3 + $0x10] sm:$0xff]  ;;  %v306_v6 = vld [vmem:[%s1338_s3 + $0x8] sm:$0xff]  ;;  %s1131_s15 = scalar_select %p294_p10, %s1078_s28, 1  ;;  %vm359_vm0 = vcmask 261120   ;;  %vm538_vm1 = vcmask 64512  }
  0x14   : > { %v316_v1 = vld [vmem:[%s1338_s3 + $0x58] sm:$0xff]  ;;  %375 = vmatpush.msra.mxu0 %v308_v0  ;;  %v315_v4 = vld [vmem:[%s1338_s3 + $0x50] sm:$0xff]  ;;  %v314_v7 = vld [vmem:[%s1338_s3 + $0x48] sm:$0xff]  ;;  %v1014_v59 = vmov 0  }
  0x15   : > { %v320_v2 = vld [vmem:[%s1338_s3 + $0x78] sm:$0xff]  ;;  %415 = vmatpush.msra.mxu2 %v316_v1  ;;  %v319_v5 = vld [vmem:[%s1338_s3 + $0x70] sm:$0xff]  ;;  %v318_v8 = vld [vmem:[%s1338_s3 + $0x68] sm:$0xff]  ;;  %s860_s22 = sshll.u32 %s1131_s15, 3  ;;  %s304_s13 = scalar_lea.vmem %s1337_s2, %s1131_s15 }
  0x16   : > { %435 = vmatpush.msra.mxu3 %v320_v2  ;;  %376 = vmatpush.msra.mxu0 %v307_v3  ;;  %v305_v9 = vld [vmem:[%s1338_s3] sm:$0xff]  ;;  %v312_v11 = vld [vmem:[%s1338_s3 + $0x38] sm:$0xff]  ;;  %s297_s16 = scalar_lea.vmem %s1335_s0, %s860_s22  ;;  %v311_v17 = vld [vmem:[%s1338_s3 + $0x30] sm:$0xff]  ;;  %s301_s29 = scalar_lea.vmem %s1336_s1, %s860_s22 }
  0x17   : > { %416 = vmatpush.msra.mxu2 %v315_v4  ;;  %v313_v10 = vld [vmem:[%s1338_s3 + $0x40] sm:$0xff]  ;;  %395 = vmatpush.msra.mxu1 %v312_v11  ;;  %v324_v14 = vld [vmem:[%s1340_s5 + $0x18] sm:$0xff]  ;;  %v323_v18 = vld [vmem:[%s1340_s5 + $0x10] sm:$0xff]  ;;  %s291_s15 = sand.u32 1, %s1004_s25  }
  0x18   : > { %436 = vmatpush.msra.mxu3 %v319_v5  ;;  %377 = vmatpush.msra.mxu0 %v306_v6  ;;  %v317_v12 = vld [vmem:[%s1338_s3 + $0x60] sm:$0xff]  ;;  %v332_v15 = vld [vmem:[%s1340_s5 + $0x58] sm:$0xff]  ;;  %v331_v19 = vld [vmem:[%s1340_s5 + $0x50] sm:$0xff]  ;;  %s859_s14 = sshll.u32 %s291_s15, 5  ;;  %s757_s21 = scalar_lea.sflag [#allocation3], %s291_s15 }
  0x19   : > { %417 = vmatpush.msra.mxu2 %v314_v7  ;;  %v345_v13 = vld [vmem:[%s297_s16] sm:$0xff]  ;;  %v336_v16 = vld [vmem:[%s1340_s5 + $0x78] sm:$0xff]  ;;  %v335_v20 = vld [vmem:[%s1340_s5 + $0x70] sm:$0xff]  ;;  %396 = vmatpush.msra.mxu1 %v311_v17  ;;  %s1289_s22 = scalar_lea.vmem [#allocation2], %s859_s14  ;;  %s883_s16 = sshll.u32 %s1078_s28, 5 }
  0x1a   : > { %437 = vmatpush.msra.mxu3 %v318_v8  ;;  %378 = vmatpush.msra.mxu0 %v305_v9  ;;  %v310_v21 = vld [vmem:[%s1338_s3 + $0x28] sm:$0xff]  ;;  %v309_v25 = vld [vmem:[%s1338_s3 + $0x20] sm:$0xff]  ;;  %v328_v30 = vld [vmem:[%s1340_s5 + $0x38] sm:$0xff]  ;;  %s768_s19 = scalar_lea.hbm %s1342_s7, %s883_s16  ;;  %s769_s20 = sshll.u32 %s1289_s22, 4  ;;  %s770_s20 = int_to_ptr.vmem [resolvable:$true] %s769_s20 }
  0x1b   : > { %418 = vmatpush.msra.mxu2 %v313_v10  ;;  %862 = vmatmul.msk.f32.vlgmr.msra.gmra.mxu0 %vm359_vm0, %v345_v13  ;;  %v322_v22 = vld [vmem:[%s1340_s5 + $0x8] sm:$0xff]  ;;  %v321_v26 = vld [vmem:[%s1340_s5] sm:$0xff]  ;;  %v327_v31 = vld [vmem:[%s1340_s5 + $0x30] sm:$0xff]  ;;  %s771_s28 = sshll.u32 %s768_s19, 4  ;;  %s772_s28 = int_to_ptr.hbm [resolvable:$true] %s771_s28 }
  0x1c   : > { %438 = vmatpush.msra.mxu3 %v317_v12  ;;  %864 = vmatmul.msk.f32.vlgmr.msra.gmra.mxu2 %vm359_vm0, %v345_v13  ;;  %v330_v23 = vld [vmem:[%s1340_s5 + $0x48] sm:$0xff]  ;;  %v329_v27 = vld [vmem:[%s1340_s5 + $0x40] sm:$0xff]  ;;  %s964_s23 = sshra.s32 %s772_s28, 4  ;;  %s965_s23 = int_to_ptr.hbm [resolvable:$true] %s964_s23 }
  0x1d   : > { %865 = vmatmul.msk.f32.vlgmr.msra.gmra.mxu3 %vm359_vm0, %v345_v13  ;;  %470 = vmatpush.msrb.mxu0 %v324_v14  ;;  %v334_v24 = vld [vmem:[%s1340_s5 + $0x68] sm:$0xff]  ;;  %v333_v28 = vld [vmem:[%s1340_s5 + $0x60] sm:$0xff]  ;;  %p971_p0 = scmp.lt.s32.totalorder %s965_s23, %s1342_s7 }
  0x1e   : > { %510 = vmatpush.msrb.mxu2 %v332_v15  ;;  %530 = vmatpush.msrb.mxu3 %v336_v16  ;;  %v346_v29 = vld [vmem:[%s301_s29] sm:$0xff]  ;;  %v326_v32 = vld [vmem:[%s1340_s5 + $0x28] sm:$0xff]  ;;  %s966_s29 = scalar_lea.hbm %s965_s23, 32 }
  0x1f   : > { %471 = vmatpush.msrb.mxu0 %v323_v18  ;;  %397 = vmatpush.msra.mxu1 %v310_v21  ;;  %v325_v33 = vld [vmem:[%s1340_s5 + $0x20] sm:$0xff]  ;;  %p967_p11 = scmp.ne.s32.totalorder %s965_s23, %s966_s29 }
  0x20   : > { %511 = vmatpush.msrb.mxu2 %v331_v19  ;;  %531 = vmatpush.msrb.mxu3 %v335_v20  ;;  %v930_v37 = vld [vmem:[%s1341_s6] ss:$0 sm:$0xff]  ;;  %v931_v43 = vld [vmem:[%s1341_s6 + $0x2] ss:$0 sm:$0xff]  ;;  %v932_v44 = vld [vmem:[%s1341_s6 + $0x3] ss:$0 sm:$0xff] }
  0x21   : > { %472 = vmatpush.msrb.mxu0 %v322_v22  ;;  %398 = vmatpush.msra.mxu1 %v309_v25  ;;  %v926_v38 = vld [vmem:[%s1339_s4] ss:$0 sm:$0xff]  ;;  %v933_v45 = vld [vmem:[%s1341_s6 + $0x1] ss:$0 sm:$0xff]  ;;  %v927_v46 = vld [vmem:[%s1339_s4 + $0x2] ss:$0 sm:$0xff]  ;;  %p968_p12 = pnand %p967_p11, %p1095_p5 }
  0x22   : > { %512 = vmatpush.msrb.mxu2 %v330_v23  ;;  %532 = vmatpush.msrb.mxu3 %v334_v24  ;;  %v929_v47 = vld [vmem:[%s1339_s4 + $0x1] ss:$0 sm:$0xff]  ;;  %v928_v49 = vld [vmem:[%s1339_s4 + $0x3] ss:$0 sm:$0xff]  ;;  %v647_v58 = vld [vmem:[%s304_s13] sm:$0x1] }
  0x23   : > { %473 = vmatpush.msrb.mxu0 %v321_v26  ;;  %863 = vmatmul.msk.f32.vlgmr.msra.gmra.mxu1 %vm359_vm0, %v345_v13  ;;  %vm648_vm2 = vcmp.eq.f32.partialorder %v647_v58, 0.0  ;;  %p969_p13 = pneg %p968_p12  ;;  %s970_s13 = scalar_lea.hbm %s1342_s7, 64 }
  0x24   : > { %513 = vmatpush.msrb.mxu2 %v329_v27  ;;  %533 = vmatpush.msrb.mxu3 %v333_v28  ;;  %v649_v60 = vsel %vm648_vm2, 1, %v1014_v59  ;;  %p972_p1 = scmp.lt.s32.totalorder %s970_s13, %s966_s29 }
  0x25   : > { %866 = vmatmul.msk.f32.vlgmr.msrb.gmra.mxu0 %vm359_vm0, %v346_v29  ;;  %868 = vmatmul.msk.f32.vlgmr.msrb.gmra.mxu2 %vm359_vm0, %v346_v29  ;;  %v650_v61 = vperm.slane %v649_v60, 0 }
  0x26   : > { %869 = vmatmul.msk.f32.vlgmr.msrb.gmra.mxu3 %vm359_vm0, %v346_v29  ;;  %490 = vmatpush.msrb.mxu1 %v328_v30  ;;  %p973_p2 = por %p972_p1, %p971_p0 }
  0x27   : > { %vm1260_vm3 = vcmp.eq.s32.totalorder %v650_v61, 1 }
  0x28   : > { %491 = vmatpush.msrb.mxu1 %v327_v31  ;;  %p974_p3 = pnand %p973_p2, %p969_p13 }
  0x2a   : > { %492 = vmatpush.msrb.mxu1 %v326_v32 }
  0x2c   : > { %493 = vmatpush.msrb.mxu1 %v325_v33 }
  0x2d   : > { %867 = vmatmul.msk.f32.vlgmr.msrb.gmra.mxu1 %vm359_vm0, %v346_v29 }
  0x98   : > { %v380_v34 = vpop.f32.mrf.mxu0 }
  0x99   : > { %v381_v42 = vadd.f32 %v926_v38, %v380_v34 }
  0x9f   : > { %v420_v35 = vpop.f32.mrf.mxu2 }
  0xa0   : > { %v440_v36 = vpop.f32.mrf.mxu3  ;;  %v400_v39 = vpop.f32.mrf.mxu1  ;;  %v421_v55 = vadd.f32 %v927_v46, %v420_v35 }
  0xa1   : > { %v401_v56 = vadd.f32 %v929_v47, %v400_v39  ;;  %v441_v57 = vadd.f32 %v928_v49, %v440_v36 }
  0xa2   : > { %v475_v40 = vpop.f32.mrf.mxu0 }
  0xa3   : > { %v476_v41 = vadd.f32 %v930_v37, %v475_v40 }
  0xa5   : > { %870 = vmatpush.xpose.msk.msra.mxu0 %vm538_vm1, %v476_v41 }
  0xa8   : > { %v515_v48 = vpop.f32.mrf.mxu2  ;;  %871 = vmatmul.msk.f32.vlgmr.msra.gmra.mxu0 %vm538_vm1, %v381_v42 }
  0xa9   : > { %v516_v50 = vadd.f32 %v931_v43, %v515_v48  ;;  %v535_v51 = vpop.f32.mrf.mxu3 }
  0xaa   : > { %v536_v52 = vadd.f32 %v932_v44, %v535_v51  ;;  %v495_v53 = vpop.f32.mrf.mxu1 }
  0xab   : > { %v496_v54 = vadd.f32 %v933_v45, %v495_v53  ;;  %874 = vmatpush.xpose.msk.msra.mxu2 %vm538_vm1, %v516_v50 }
  0xac   : > { %876 = vmatpush.xpose.msk.msra.mxu3 %vm538_vm1, %v536_v52 }
  0xad   : > { %872 = vmatpush.xpose.msk.msra.mxu1 %vm538_vm1, %v496_v54 }
  0xae   : > { %875 = vmatmul.msk.f32.vlgmr.msra.gmra.mxu2 %vm538_vm1, %v421_v55 }
  0xaf   : > { %877 = vmatmul.msk.f32.vlgmr.msra.gmra.mxu3 %vm538_vm1, %v441_v57 }
  0xb0   : > { %873 = vmatmul.msk.f32.vlgmr.msra.gmra.mxu1 %vm538_vm1, %v401_v56 }
 0x125   : > { %v562_v62 = vpop.f32.mrf.mxu0 }
 0x126   : > { %v643_v0 = vmul.f32 0.35355338, %v562_v62 }
 0x128   : > { %v652_v1 = vsel %vm1260_vm3, -1e+09, %v643_v0 }
 0x129   : > { %v656_v2 = vsel %vm538_vm1, %v652_v1, -inf }
 0x12a   : > { %657 = vmax.xlane.f32.xlu0 %v656_v2 }
 0x12d   : > { %v588_v3 = vpop.f32.mrf.mxu1 }
 0x12e   : > { %v644_v4 = vmul.f32 0.35355338, %v588_v3 }
 0x130   : > { %v653_v5 = vsel %vm1260_vm3, -1e+09, %v644_v4 }
 0x131   : > { %v614_v6 = vpop.f32.mrf.mxu2  ;;  %v659_v7 = vsel %vm538_vm1, %v653_v5, -inf }
 0x132   : > { %v645_v8 = vmul.f32 0.35355338, %v614_v6  ;;  %660 = vmax.xlane.f32.xlu0 %v659_v7  ;;  %v640_v9 = vpop.f32.mrf.mxu3 }
 0x133   : > { %v646_v12 = vmul.f32 0.35355338, %v640_v9 }
 0x134   : > { %v654_v10 = vsel %vm1260_vm3, -1e+09, %v645_v8 }
 0x135   : > { %v662_v11 = vsel %vm538_vm1, %v654_v10, -inf  ;;  %v655_v13 = vsel %vm1260_vm3, -1e+09, %v646_v12 }
 0x136   : > { %663 = vmax.xlane.f32.xlu1 %v662_v11  ;;  %v665_v14 = vsel %vm538_vm1, %v655_v13, -inf }
 0x13e   : > { %666 = vmax.xlane.f32.xlu1 %v665_v14 }
 0x19d   : > { %v658_v15 = vpop.xlane.xlu0 %657 }
 0x19e   : > { %v668_v16 = vsub.f32 %v652_v1, %v658_v15 }
 0x1a0   : > { %v672_v17 = vmul.f32 1.442695, %v668_v16 }
 0x1a2   : > { %934 = vpow2.f32 %v672_v17 }
 0x1a5   : > { %v661_v18 = vpop.xlane.xlu0 %660 }
 0x1a6   : > { %v669_v19 = vsub.f32 %v653_v5, %v661_v18 }
 0x1a8   : > { %v935_v20 = vpop.eup %934  ;;  %v674_v21 = vmul.f32 1.442695, %v669_v19 }
 0x1a9   : > { %v664_v22 = vpop.xlane.xlu1 %663  ;;  %v680_v23 = vsel %vm538_vm1, %v935_v20, 0.0 }
 0x1aa   : > { %936 = vpow2.f32 %v674_v21  ;;  %v670_v24 = vsub.f32 %v654_v10, %v664_v22  ;;  %681 = vadd.xlane.f32.xlu2 %v680_v23 }
 0x1ac   : > { %v676_v25 = vmul.f32 1.442695, %v670_v24 }
 0x1ae   : > { %938 = vpow2.f32 %v676_v25 }
 0x1b0   : > { %v937_v26 = vpop.eup %936 }
 0x1b1   : > { %v667_v27 = vpop.xlane.xlu1 %666  ;;  %v683_v28 = vsel %vm538_vm1, %v937_v26, 0.0 }
 0x1b2   : > { %v671_v29 = vsub.f32 %v655_v13, %v667_v27  ;;  %684 = vadd.xlane.f32.xlu2 %v683_v28 }
 0x1b4   : > { %v1278_v30 = vpop.eup %938  ;;  %v678_v31 = vmul.f32 1.442695, %v671_v29 }
 0x1b5   : > { %v686_v32 = vsel %vm538_vm1, %v1278_v30, 0.0 }
 0x1b6   : > { %940 = vpow2.f32 %v678_v31  ;;  %687 = vadd.xlane.f32.xlu0 %v686_v32 }
 0x1bc   : > { %v1282_v33 = vpop.eup %940 }
 0x1bd   : > { %v689_v34 = vsel %vm538_vm1, %v1282_v33, 0.0 }
 0x1be   : > { %690 = vadd.xlane.f32.xlu1 %v689_v34 }
 0x21d   : > { %v682_v35 = vpop.xlane.xlu2 %681 }
 0x21e   : > { %942 = vrcp.f32 %v682_v35  ;;  %v703_v40 = vand.u32 2147483648, %v682_v35  ;;  %v701_v42 = vand.u32 2147483647, %v682_v35  ;;  %vm697_vm5 = vweird.f32 %v682_v35 }
 0x220   : > { %v704_v46 = vor.u32 1.1754944e-38, %v703_v40  ;;  %vm702_vm7 = vcmp.eq.f32.partialorder %v701_v42, 8.507059e+37 }
 0x224   : > { %v943_v36 = vpop.eup %942 }
 0x225   : > { %v693_v37 = vmul.f32 %v943_v36, %v682_v35  ;;  %v685_v38 = vpop.xlane.xlu2 %684  ;;  %vm698_vm4 = vweird.f32 %v943_v36 }
 0x226   : > { %944 = vrcp.f32 %v685_v38  ;;  %vm699_vm6 = vmor %vm697_vm5, %vm698_vm4  ;;  %v715_v53 = vand.u32 2147483647, %v685_v38  ;;  %v717_v54 = vand.u32 2147483648, %v685_v38  ;;  %vm711_vm9 = vweird.f32 %v685_v38 }
 0x227   : > { %v694_v39 = vsub.f32 1.0, %v693_v37 }
 0x228   : > { %vm716_vm11 = vcmp.eq.f32.partialorder %v715_v53, 8.507059e+37  ;;  %v718_v60 = vor.u32 1.1754944e-38, %v717_v54 }
 0x229   : > { %v695_v41 = vmul.f32 %v943_v36, %v694_v39  ;;  %v688_v43 = vpop.xlane.xlu0 %687 }
 0x22a   : > { %946 = vrcp.f32 %v688_v43  ;;  %v731_v61 = vand.u32 2147483648, %v688_v43  ;;  %v729_v0 = vand.u32 2147483647, %v688_v43  ;;  %vm725_vm13 = vweird.f32 %v688_v43 }
 0x22b   : > { %v696_v44 = vadd.f32 %v943_v36, %v695_v41 }
 0x22c   : > { %v945_v45 = vpop.eup %944  ;;  %v732_v5 = vor.u32 1.1754944e-38, %v731_v61  ;;  %vm730_vm15 = vcmp.eq.f32.partialorder %v729_v0, 8.507059e+37 }
 0x22d   : > { %v700_v47 = vsel %vm699_vm6, %v943_v36, %v696_v44  ;;  %v707_v48 = vmul.f32 %v945_v45, %v685_v38  ;;  %vm712_vm8 = vweird.f32 %v945_v45 }
 0x22e   : > { %v705_v49 = vsel %vm702_vm7, %v704_v46, %v700_v47  ;;  %vm713_vm10 = vmor %vm711_vm9, %vm712_vm8 }
 0x22f   : > { %v748_v50 = vmul.f32 %v935_v20, %v705_v49  ;;  %v708_v51 = vsub.f32 1.0, %v707_v48 }
 0x230   : > { %v947_v52 = vpop.eup %946 }
 0x231   : > { %752 = vst.msk [vmem:[%s1289_s22] sm:$0xff] %vm538_vm1, %v748_v50  ;;  %v709_v55 = vmul.f32 %v945_v45, %v708_v51  ;;  %v721_v56 = vmul.f32 %v947_v52, %v688_v43  ;;  %v691_v57 = vpop.xlane.xlu1 %690  ;;  %vm726_vm12 = vweird.f32 %v947_v52 }
 0x232   : > { %948 = vrcp.f32 %v691_v57  ;;  %vm727_vm14 = vmor %vm725_vm13, %vm726_vm12  ;;  %v745_v11 = vand.u32 2147483648, %v691_v57  ;;  %v743_v13 = vand.u32 2147483647, %v691_v57  ;;  %vm739_vm2 = vweird.f32 %v691_v57 }
 0x233   : > { %v710_v58 = vadd.f32 %v945_v45, %v709_v55  ;;  %v722_v59 = vsub.f32 1.0, %v721_v56 }
 0x234   : > { %v746_v15 = vor.u32 1.1754944e-38, %v745_v11  ;;  %vm744_vm4 = vcmp.eq.f32.partialorder %v743_v13, 8.507059e+37 }
 0x235   : > { %v714_v62 = vsel %vm713_vm10, %v945_v45, %v710_v58  ;;  %v723_v63 = vmul.f32 %v947_v52, %v722_v59 }
 0x236   : > { %v719_v1 = vsel %vm716_vm11, %v718_v60, %v714_v62 }
 0x237   : > { %v749_v2 = vmul.f32 %v937_v26, %v719_v1  ;;  %v724_v3 = vadd.f32 %v947_v52, %v723_v63 }
 0x238   : > { %v949_v4 = vpop.eup %948 }
 0x239   : > { %753 = vst.msk [vmem:[%s1289_s22 + $0x8] sm:$0xff] %vm538_vm1, %v749_v2  ;;  %v728_v6 = vsel %vm727_vm14, %v947_v52, %v724_v3  ;;  %v735_v7 = vmul.f32 %v949_v4, %v691_v57  ;;  %vm740_vm0 = vweird.f32 %v949_v4 }
 0x23a   : > { %v733_v8 = vsel %vm730_vm15, %v732_v5, %v728_v6  ;;  %vm741_vm3 = vmor %vm739_vm2, %vm740_vm0 }
 0x23b   : > { %v750_v9 = vmul.f32 %v1278_v30, %v733_v8  ;;  %v736_v10 = vsub.f32 1.0, %v735_v7 }
 0x23d   : > { %754 = vst.msk [vmem:[%s1289_s22 + $0x10] sm:$0xff] %vm538_vm1, %v750_v9  ;;  %v737_v12 = vmul.f32 %v949_v4, %v736_v10 }
 0x23f   : > { %v738_v14 = vadd.f32 %v949_v4, %v737_v12 }
 0x241   : > { %v742_v16 = vsel %vm741_vm3, %v949_v4, %v738_v14 }
 0x242   : > { %v747_v17 = vsel %vm744_vm4, %v746_v15, %v742_v16 }
 0x243   : > { %v751_v18 = vmul.f32 %v1282_v33, %v747_v17 }
 0x245   : > { %755 = vst.msk [vmem:[%s1289_s22 + $0x18] sm:$0xff] %vm538_vm1, %v751_v18 }
 0x246   : > { %977 = shalt.err (!%p974_p3)
}
 0x247   : > { %s1015_s15 = smov 128   ;;  %s1016_s22 = smov 8  }
 0x248   : > { %884 = dma.vmem_to_hbm [thread:$0]  (%p1095_p5), %s770_s20, 512, %s772_s28, %s757_s21, %s1015_s15, %s1015_s15, %s1016_s22  }
 0x249 PF: > { %p890_p4 = scmp.ge.s32.totalorder %s1012_s27, 2  ;;  %s786_s17 = sand.u32 1, %s1000_s24  }
 0x24a   : > { %s787_s18 = scalar_lea.sflag [#allocation3], %s786_s17 }
 0x24b   : > { %p887_p7 = pnand %p890_p4, %p1099_p6 }
 0x24d   : > { %p888_p8 = pneg %p887_p7 }
 0x24f   : > { %995 = dma.done.wait (%p888_p8), %s787_s18, 512  }
 0x250   : > { %997 = vsyncadd (%p888_p8), %s787_s18, 4294966784  ;;  %p17_p9 = scmp.ge.s32.totalorder %s1082_s30, 4   ;;  %s1347_s24 = smov %s1004_s25 }
 0x251   : > { %s1348_s25 = smov %s1008_s26  ;;  %s1349_s26 = smov %s1093_s10 }
 0x252   : > { %s1350_s27 = smov %s1082_s30  ;;  %19 = sbr.rel (!%p17_p9) target bundleno = 3 (0x3), region = 89 }
 0x257   :  { %793 = vsyncpa [#allocation3], 1 }
 0x258   :  { %795 = vsyncpa [#allocation3 + $0x1], 1 }

</bundles_post_ra>
